<compile_context>
chip_gen: v7x
topology: tpu7x:2x2x1
jax: 0.10.0
libtpu: 0.0.40
codegen_flags: <defaults>
</compile_context>

<pallas_src>
from functools import partial

import jax
import jax.numpy as jnp
import numpy as np
from jax.experimental import pallas as pl
from jax.experimental.pallas import tpu as pltpu


# ------------------------------ Pallas kernel ------------------------------

def _ensemble_mlp_kernel(x_ref, w1_ref, b1_ref, w2_ref, b2_ref, w3_ref, b3_ref, o_ref):
    # One grid step = one tile of rows through the whole fused ensemble (3 MXU matmuls).
    x = x_ref[...]                                                       # (tile_n, D)
    h1 = jnp.dot(x, w1_ref[...], preferred_element_type=jnp.float32) + b1_ref[...]
    h1 = jnp.maximum(h1, 0.0)                                            # (tile_n, M*H1)
    h2 = jnp.dot(h1, w2_ref[...], preferred_element_type=jnp.float32) + b2_ref[...]
    h2 = jnp.maximum(h2, 0.0)                                            # (tile_n, M*H2)
    out = jnp.dot(h2, w3_ref[...], preferred_element_type=jnp.float32) + b3_ref[...]
    o_ref[...] = out.astype(o_ref.dtype)                                 # (tile_n, M*num_out)


# ---------------------------- weight packing (once, at init) ----------------

def pack_params(params):
    """Pack per-model weights (M, in, out) into fused / block-diagonal layouts.

    W1 -> (D, M*H1) column-concatenated (model-major columns)
    W2 -> (M*H1, M*H2) block-diagonal
    W3 -> (M*H2, M*num_out) block-diagonal
    biases -> (1, M*width)
    Model-major column order makes the kernel output exactly torch.cat(outputs, dim=1).
    Call ONCE (e.g. at init / after a parameter update), not per forward call.
    """
    w1, b1, w2, b2, w3, b3 = params
    M, D, H1 = w1.shape
    H2 = w2.shape[2]
    num_out = w3.shape[2]

    w1c = jnp.transpose(w1, (1, 0, 2)).reshape(D, M * H1)
    b1c = b1.reshape(1, M * H1)

    eye = jnp.eye(M, dtype=w2.dtype)                                     # (M, M)
    # T[m, i, m', j] = eye[m, m'] * W[m, i, j]  ->  block-diagonal after reshape
    w2bd = (eye[:, None, :, None] * w2[:, :, None, :]).reshape(M * H1, M * H2)
    b2c = b2.reshape(1, M * H2)
    w3bd = (eye[:, None, :, None] * w3[:, :, None, :]).reshape(M * H2, M * num_out)
    b3c = b3.reshape(1, M * num_out)
    return (w1c, b1c, w2bd, b2c, w3bd, b3c)


# ------------------------------ jitted forward ------------------------------

def _round_up(x, m):
    return ((x + m - 1) // m) * m


@partial(jax.jit, static_argnames=("max_tile_n",))
def multiple_mlp_forward(x, packed, max_tile_n=256):
    """x: (N, ...) any trailing shape; flattened to (N, D).
    packed: output of pack_params (precomputed once).
    Returns (N, M*num_out), identical layout to torch.cat(outputs, dim=1)."""
    w1c, b1c, w2bd, b2c, w3bd, b3c = packed
    N = x.shape[0]
    x2d = x.reshape(N, -1).astype(jnp.float32)                           # data.view(num_data, -1)
    D = x2d.shape[1]
    assert D == w1c.shape[0], (D, w1c.shape)
    MH1, MH2, MO = w1c.shape[1], w2bd.shape[1], w3bd.shape[1]

    # Row tiling: multiples of 8 sublanes, up to max_tile_n rows per grid step.
    tile_n = min(max_tile_n, _round_up(N, 8))
    n_pad = _round_up(N, tile_n)
    if n_pad != N:
        x2d = jnp.pad(x2d, ((0, n_pad - N), (0, 0)))
    grid_n = n_pad // tile_n

    out = pl.pallas_call(
        _ensemble_mlp_kernel,
        out_shape=jax.ShapeDtypeStruct((n_pad, MO), jnp.float32),
        grid_spec=pltpu.PrefetchScalarGridSpec(
            num_scalar_prefetch=0,
            grid=(grid_n,),                                   # row tiles stream through
            in_specs=[
                pl.BlockSpec((tile_n, D), lambda i: (i, 0)),  # x: tiled over rows
                pl.BlockSpec((D, MH1), lambda i: (0, 0)),     # W1 concatenated (resident)
                pl.BlockSpec((1, MH1), lambda i: (0, 0)),     # b1 concatenated
                pl.BlockSpec((MH1, MH2), lambda i: (0, 0)),   # W2 block-diagonal
                pl.BlockSpec((1, MH2), lambda i: (0, 0)),     # b2 concatenated
                pl.BlockSpec((MH2, MO), lambda i: (0, 0)),    # W3 block-diagonal
                pl.BlockSpec((1, MO), lambda i: (0, 0)),      # b3 concatenated
            ],
            out_specs=pl.BlockSpec((tile_n, MO), lambda i: (i, 0)),
        ),
        compiler_params=pltpu.CompilerParams(
            dimension_semantics=("parallel",),                # shard row tiles across TCs (v7x)
            vmem_limit_bytes=64 * 1024 * 1024,
        ),
    )(x2d, w1c, b1c, w2bd, b2c, w3bd, b3c)

    return out[:N] if n_pad != N else out                     # (N, M*num_out)


# --------------------------- parameter construction -------------------------

def _xavier_normal(key, shape, gain=1.0):
    # shape = (fan_in, fan_out) in our (in, out) layout
    fan_in, fan_out = shape[-2], shape[-1]
    std = gain * np.sqrt(2.0 / (fan_in + fan_out))
    return std * jax.random.normal(key, shape, dtype=jnp.float32)


def init_params(key, input_dim, layer_widths, num_models, num_out, gain):
    """Deterministic synthetic init (xavier-normal weights, zero biases),
    mirroring MLPModel.initialize() with ReLU gain."""
    assert len(layer_widths) == 2, "script configured for two hidden layers"
    h1, h2 = layer_widths
    keys = jax.random.split(key, num_models * 3).reshape(num_models, 3, 2)
    w1 = jnp.stack([_xavier_normal(keys[m, 0], (input_dim, h1), gain) for m in range(num_models)])
    w2 = jnp.stack([_xavier_normal(keys[m, 1], (h1, h2), gain) for m in range(num_models)])
    w3 = jnp.stack([_xavier_normal(keys[m, 2], (h2, num_out), 1.0) for m in range(num_models)])
    b1 = jnp.zeros((num_models, 1, h1), jnp.float32)
    b2 = jnp.zeros((num_models, 1, h2), jnp.float32)
    b3 = jnp.zeros((num_models, 1, num_out), jnp.float32)
    return (w1, b1, w2, b2, w3, b3)


def reference_forward(x, params):
    """Pure-JAX reference of MultipleMLPModel.forward (ReLU activation)."""
    w1, b1, w2, b2, w3, b3 = params
    N = x.shape[0]
    x2d = x.reshape(N, -1).astype(jnp.float32)
    outs = []
    for m in range(w1.shape[0]):
        h1 = jnp.maximum(x2d @ w1[m] + b1[m], 0.0)
        h2 = jnp.maximum(h1 @ w2[m] + b2[m], 0.0)
        outs.append(h2 @ w3[m] + b3[m])
    return jnp.concatenate(outs, axis=1)


# ----------------------------------- main -----------------------------------

if __name__ == "__main__":
    key = jax.random.PRNGKey(0)
    kx, kp = jax.random.split(key)

    # Small shapes consistent with the module:
    #   data: (batch=8, 2, 4, 4)  -> flattened input_dim = 32
    #   layer_widths = [32, 32], num_models = 3, num_out = 1, activation = ReLU
    batch, C, H, W = 8, 2, 4, 4
    input_dim = C * H * W
    layer_widths = [32, 32]
    num_models = 3
    num_out = 1
    relu_gain = float(np.sqrt(2.0))  # nn.init.calculate_gain('relu')

    x = jax.random.normal(kx, (batch, C, H, W), dtype=jnp.float32)
    params = init_params(kp, input_dim, layer_widths, num_models, num_out, relu_gain)

    # Pack once at init; the jitted forward reuses the packed arrays on every call.
    packed = jax.tree_util.tree_map(jax.block_until_ready, pack_params(params))

    out = multiple_mlp_forward(x, packed)
    out = jax.block_until_ready(out)
    assert out.shape == (batch, num_models * num_out), out.shape

    # Second call exercises the cached-compile / pre-packed fast path.
    out2 = jax.block_until_ready(multiple_mlp_forward(x, packed))

    ref = jax.block_until_ready(reference_forward(x, params))
    assert np.allclose(np.asarray(out), np.asarray(ref), atol=1e-5, rtol=1e-5)
    assert np.allclose(np.asarray(out2), np.asarray(ref), atol=1e-5, rtol=1e-5)

    print("KERNEL_OK")
</pallas_src>

<mosaic_0001>
module attributes {stable_mosaic.version = 11 : i64} {
  func.func @_ensemble_mlp_kernel(%arg0: i32, %arg1: memref<8x32xf32, #tpu.memory_space<vmem>>, %arg2: memref<32x96xf32, #tpu.memory_space<vmem>>, %arg3: memref<1x96xf32, #tpu.memory_space<vmem>>, %arg4: memref<96x96xf32, #tpu.memory_space<vmem>>, %arg5: memref<1x96xf32, #tpu.memory_space<vmem>>, %arg6: memref<96x3xf32, #tpu.memory_space<vmem>>, %arg7: memref<1x3xf32, #tpu.memory_space<vmem>>, %arg8: memref<8x3xf32, #tpu.memory_space<vmem>>) attributes {dimension_semantics = [#tpu.dimension_semantics<parallel>], iteration_bounds = array<i64: 1>, scalar_prefetch = 0 : i64, scratch_operands = 0 : i64, tpu.core_type = #tpu.core_type<tc>, window_params = [{transform_indices = @transform_0, window_bounds = array<i64: 8, 32>}, {pipeline_mode = #tpu.pipeline_mode<synchronous>, transform_indices = @transform_1, window_bounds = array<i64: 32, 96>}, {pipeline_mode = #tpu.pipeline_mode<synchronous>, transform_indices = @transform_2, window_bounds = array<i64: 1, 96>}, {pipeline_mode = #tpu.pipeline_mode<synchronous>, transform_indices = @transform_3, window_bounds = array<i64: 96, 96>}, {pipeline_mode = #tpu.pipeline_mode<synchronous>, transform_indices = @transform_4, window_bounds = array<i64: 1, 96>}, {pipeline_mode = #tpu.pipeline_mode<synchronous>, transform_indices = @transform_5, window_bounds = array<i64: 96, 3>}, {pipeline_mode = #tpu.pipeline_mode<synchronous>, transform_indices = @transform_6, window_bounds = array<i64: 1, 3>}, {transform_indices = @transform_7, window_bounds = array<i64: 8, 3>}]} {
    %c0 = arith.constant 0 : index
    %c0_0 = arith.constant 0 : index
    %0 = vector.load %arg1[%c0, %c0_0] : memref<8x32xf32, #tpu.memory_space<vmem>>, vector<8x32xf32>
    %c0_1 = arith.constant 0 : index
    %c0_2 = arith.constant 0 : index
    %1 = vector.load %arg2[%c0_1, %c0_2] : memref<32x96xf32, #tpu.memory_space<vmem>>, vector<32x96xf32>
    %cst = arith.constant dense<0.000000e+00> : vector<8x96xf32>
    %2 = tpu.matmul %0, %1, %cst {dimension_numbers = #tpu.dot_dimension_numbers<[1], [0], [0], [1], [0, 0, 1, 1], [], []>} : vector<8x32xf32>, vector<32x96xf32>, vector<8x96xf32> -> vector<8x96xf32>
    %c0_3 = arith.constant 0 : index
    %c0_4 = arith.constant 0 : index
    %3 = vector.load %arg3[%c0_3, %c0_4] : memref<1x96xf32, #tpu.memory_space<vmem>>, vector<1x96xf32>
    %4 = vector.broadcast %3 : vector<1x96xf32> to vector<8x96xf32>
    %5 = arith.addf %2, %4 : vector<8x96xf32>
    %cst_5 = arith.constant 0.000000e+00 : f32
    %6 = vector.broadcast %cst_5 : f32 to vector<8x96xf32>
    %7 = arith.maximumf %5, %6 : vector<8x96xf32>
    %c0_6 = arith.constant 0 : index
    %c0_7 = arith.constant 0 : index
    %8 = vector.load %arg4[%c0_6, %c0_7] : memref<96x96xf32, #tpu.memory_space<vmem>>, vector<96x96xf32>
    %cst_8 = arith.constant dense<0.000000e+00> : vector<8x96xf32>
    %9 = tpu.matmul %7, %8, %cst_8 {dimension_numbers = #tpu.dot_dimension_numbers<[1], [0], [0], [1], [0, 0, 1, 1], [], []>} : vector<8x96xf32>, vector<96x96xf32>, vector<8x96xf32> -> vector<8x96xf32>
    %c0_9 = arith.constant 0 : index
    %c0_10 = arith.constant 0 : index
    %10 = vector.load %arg5[%c0_9, %c0_10] : memref<1x96xf32, #tpu.memory_space<vmem>>, vector<1x96xf32>
    %11 = vector.broadcast %10 : vector<1x96xf32> to vector<8x96xf32>
    %12 = arith.addf %9, %11 : vector<8x96xf32>
    %cst_11 = arith.constant 0.000000e+00 : f32
    %13 = vector.broadcast %cst_11 : f32 to vector<8x96xf32>
    %14 = arith.maximumf %12, %13 : vector<8x96xf32>
    %c0_12 = arith.constant 0 : index
    %c0_13 = arith.constant 0 : index
    %15 = vector.load %arg6[%c0_12, %c0_13] : memref<96x3xf32, #tpu.memory_space<vmem>>, vector<96x3xf32>
    %cst_14 = arith.constant dense<0.000000e+00> : vector<8x3xf32>
    %16 = tpu.matmul %14, %15, %cst_14 {dimension_numbers = #tpu.dot_dimension_numbers<[1], [0], [0], [1], [0, 0, 1, 1], [], []>} : vector<8x96xf32>, vector<96x3xf32>, vector<8x3xf32> -> vector<8x3xf32>
    %c0_15 = arith.constant 0 : index
    %c0_16 = arith.constant 0 : index
    %17 = vector.load %arg7[%c0_15, %c0_16] : memref<1x3xf32, #tpu.memory_space<vmem>>, vector<1x3xf32>
    %18 = vector.broadcast %17 : vector<1x3xf32> to vector<8x3xf32>
    %19 = arith.addf %16, %18 : vector<8x3xf32>
    %c0_17 = arith.constant 0 : index
    %c0_18 = arith.constant 0 : index
    %20 = vector.load %arg8[%c0_17, %c0_18] : memref<8x3xf32, #tpu.memory_space<vmem>>, vector<8x3xf32>
    tpu.vector_store %arg8[%c0_17, %c0_18], %19 {strides = array<i32>} : memref<8x3xf32, #tpu.memory_space<vmem>>, vector<8x3xf32>,
    return
  }
  func.func @transform_0(%arg0: i32) -> (i32, i32) {
    %c0_i32 = arith.constant 0 : i32
    %c0_i32_0 = arith.constant 0 : i32
    return %arg0, %c0_i32 : i32, i32
  }
  func.func @transform_1(%arg0: i32) -> (i32, i32) {
    %c0_i32 = arith.constant 0 : i32
    %c0_i32_0 = arith.constant 0 : i32
    %c0_i32_1 = arith.constant 0 : i32
    return %c0_i32, %c0_i32_0 : i32, i32
  }
  func.func @transform_2(%arg0: i32) -> (i32, i32) {
    %c0_i32 = arith.constant 0 : i32
    %c0_i32_0 = arith.constant 0 : i32
    %c0_i32_1 = arith.constant 0 : i32
    return %c0_i32, %c0_i32_0 : i32, i32
  }
  func.func @transform_3(%arg0: i32) -> (i32, i32) {
    %c0_i32 = arith.constant 0 : i32
    %c0_i32_0 = arith.constant 0 : i32
    %c0_i32_1 = arith.constant 0 : i32
    return %c0_i32, %c0_i32_0 : i32, i32
  }
  func.func @transform_4(%arg0: i32) -> (i32, i32) {
    %c0_i32 = arith.constant 0 : i32
    %c0_i32_0 = arith.constant 0 : i32
    %c0_i32_1 = arith.constant 0 : i32
    return %c0_i32, %c0_i32_0 : i32, i32
  }
  func.func @transform_5(%arg0: i32) -> (i32, i32) {
    %c0_i32 = arith.constant 0 : i32
    %c0_i32_0 = arith.constant 0 : i32
    %c0_i32_1 = arith.constant 0 : i32
    return %c0_i32, %c0_i32_0 : i32, i32
  }
  func.func @transform_6(%arg0: i32) -> (i32, i32) {
    %c0_i32 = arith.constant 0 : i32
    %c0_i32_0 = arith.constant 0 : i32
    %c0_i32_1 = arith.constant 0 : i32
    return %c0_i32, %c0_i32_0 : i32, i32
  }
  func.func @transform_7(%arg0: i32) -> (i32, i32) {
    %c0_i32 = arith.constant 0 : i32
    %c0_i32_0 = arith.constant 0 : i32
    return %arg0, %c0_i32 : i32, i32
  }
}

</mosaic_0001>

<bundles_post_ra>
// kernel: multiple_mlp_forward.1
= control target key start
LH: loop header
LB: loop body
LE: loop exit
PB: predicated region body
PF: predicated region fallthrough
CT: control target
= control target key end

     0   :  { %12 = vsyncpa [#allocation3], 0  ;;  %s925_s0 = inlined_call_operand.hbm [shape: f32[8,32], index: 0, kind: input, shape index: {}]   ;;  %s926_s1 = inlined_call_operand.hbm [shape: f32[32,96], index: 1, kind: input, shape index: {}]   ;;  %s927_s2 = inlined_call_operand.hbm [shape: f32[1,96], index: 2, kind: input, shape index: {}]   ;;  %s928_s3 = inlined_call_operand.hbm [shape: f32[96,96], index: 3, kind: input, shape index: {}]   ;;  %s929_s4 = inlined_call_operand.hbm [shape: f32[1,96], index: 4, kind: input, shape index: {}]   ;;  %s930_s5 = inlined_call_operand.hbm [shape: f32[96,3], index: 5, kind: input, shape index: {}]   ;;  %s931_s6 = inlined_call_operand.hbm [shape: f32[1,3], index: 6, kind: input, shape index: {}]   ;;  %s932_s7 = inlined_call_operand.hbm [shape: f32[8,3], index: 7, kind: output, shape index: {}]  }
   0x1   :  { %13 = vsyncpa [#allocation6], 0 }
   0x2   :  { %14 = vsyncpa [#allocation9], 0 }
   0x3   :  { %15 = vsyncpa [#allocation12], 0 }
   0x4   :  { %16 = vsyncpa [#allocation4], 0  ;;  %s750_s24 = smov [#allocation5]   ;;  %s564_s28 = scalar_lea.hbm %s926_s1, 512 }
   0x5   :  { %s32_s25 = sshll.u32 %s750_s24, 4  ;;  %p565_p0 = scmp.ne.s32.totalorder %s926_s1, %s564_s28  ;;  %s33_s25 = int_to_ptr.vmem [resolvable:$true] %s32_s25 }
   0x6   :  { %p568_p1 = scmp.lt.u32.totalorder %s564_s28, %s926_s1 }
   0x8   :  { %p570_p2 = pnand %p568_p1, %p565_p0 }
   0xa   :  { %573 = shalt.err (!%p570_p2)
}
   0xb   :  { %s574_s10 = scalar_lea.vmem %s33_s25, 512  ;;  %p579_p4 = scmp.lt.s32.totalorder %s33_s25, %s33_s25 }
   0xc   :  { %p575_p3 = scmp.ne.s32.totalorder %s33_s25, %s574_s10  ;;  %p580_p5 = scmp.lt.s32.totalorder %s574_s10, %s574_s10 }
   0xe   :  { %p581_p6 = por %p580_p5, %p579_p4 }
  0x10   :  { %p582_p7 = pnand %p581_p6, %p575_p3 }
  0x12   :  { %585 = shalt.err (!%p582_p7)
}
  0x13   :  { %s751_s11 = smov 128   ;;  %s752_s12 = smov 8  }
  0x14   :  { %38 = dma.hbm_to_vmem [thread:$0]  %s926_s1, 512, %s33_s25, [#allocation6], %s751_s11, %s751_s11, %s752_s12  }
  0x15   :  { %s753_s15 = smov [#allocation8]   ;;  %s754_s17 = smov [#allocation11]  }
  0x16   :  { %s54_s16 = sshll.u32 %s753_s15, 4  ;;  %s76_s18 = sshll.u32 %s754_s17, 4  ;;  %s55_s16 = int_to_ptr.vmem [resolvable:$true] %s54_s16  ;;  %s77_s18 = int_to_ptr.vmem [resolvable:$true] %s76_s18 }
  0x17   :  { %s586_s21 = scalar_lea.hbm %s928_s3, 1536 }
  0x18   :  { %p587_p8 = scmp.ne.s32.totalorder %s928_s3, %s586_s21  ;;  %p590_p9 = scmp.lt.u32.totalorder %s586_s21, %s928_s3 }
  0x1a   :  { %p592_p10 = pnand %p590_p9, %p587_p8 }
  0x1c   :  { %595 = shalt.err (!%p592_p10)
}
  0x1d   :  { %s596_s1 = scalar_lea.vmem %s55_s16, 1536  ;;  %p601_p12 = scmp.lt.s32.totalorder %s55_s16, %s55_s16 }
  0x1e   :  { %p597_p11 = scmp.ne.s32.totalorder %s55_s16, %s596_s1  ;;  %p602_p13 = scmp.lt.s32.totalorder %s596_s1, %s596_s1 }
  0x20   :  { %p603_p0 = por %p602_p13, %p601_p12 }
  0x22   :  { %p604_p1 = pnand %p603_p0, %p597_p11 }
  0x24   :  { %607 = shalt.err (!%p604_p1)
}
  0x25   :  { %60 = dma.hbm_to_vmem [thread:$0]  %s928_s3, 1536, %s55_s16, [#allocation9], %s751_s11, %s751_s11, %s752_s12  }
  0x26   :  { %s608_s30 = scalar_lea.hbm %s930_s5, 1536 }
  0x27   :  { %p609_p2 = scmp.ne.s32.totalorder %s930_s5, %s608_s30  ;;  %p612_p3 = scmp.lt.u32.totalorder %s608_s30, %s930_s5 }
  0x29   :  { %p614_p4 = pnand %p612_p3, %p609_p2 }
  0x2b   :  { %617 = shalt.err (!%p614_p4)
}
  0x2c   :  { %s618_s14 = scalar_lea.vmem %s77_s18, 1536  ;;  %p623_p6 = scmp.lt.s32.totalorder %s77_s18, %s77_s18 }
  0x2d   :  { %p619_p5 = scmp.ne.s32.totalorder %s77_s18, %s618_s14  ;;  %p624_p7 = scmp.lt.s32.totalorder %s618_s14, %s618_s14 }
  0x2f   :  { %p625_p8 = por %p624_p7, %p623_p6 }
  0x31   :  { %p626_p9 = pnand %p625_p8, %p619_p5 }
  0x33   :  { %629 = shalt.err (!%p626_p9)
}
  0x34   :  { %82 = dma.hbm_to_vmem [thread:$0]  %s930_s5, 1536, %s77_s18, [#allocation12], %s751_s11, %s751_s11, %s752_s12  }
  0x35   :  { %s755_s16 = smov [#allocation2]   ;;  %s756_s19 = smov [#allocation7]  }
  0x36   :  { %s23_s17 = sshll.u32 %s755_s16, 4  ;;  %s45_s20 = sshll.u32 %s756_s19, 4  ;;  %s24_s17 = int_to_ptr.vmem [resolvable:$true] %s23_s17  ;;  %s46_s20 = int_to_ptr.vmem [resolvable:$true] %s45_s20 }
  0x37   :  { %s630_s23 = scalar_lea.hbm %s925_s0, 128 }
  0x38   :  { %p631_p10 = scmp.ne.s32.totalorder %s925_s0, %s630_s23  ;;  %p634_p11 = scmp.lt.u32.totalorder %s630_s23, %s925_s0 }
  0x3a   :  { %p636_p12 = pnand %p634_p11, %p631_p10 }
  0x3c   :  { %639 = shalt.err (!%p636_p12)
}
  0x3d   :  { %s640_s5 = scalar_lea.vmem %s24_s17, 128  ;;  %p645_p0 = scmp.lt.s32.totalorder %s24_s17, %s24_s17 }
  0x3e   :  { %p641_p13 = scmp.ne.s32.totalorder %s24_s17, %s640_s5  ;;  %p646_p1 = scmp.lt.s32.totalorder %s640_s5, %s640_s5 }
  0x40   :  { %p647_p2 = por %p646_p1, %p645_p0 }
  0x42   :  { %p648_p3 = pnand %p647_p2, %p641_p13 }
  0x44   :  { %651 = shalt.err (!%p648_p3)
}
  0x45   :  { %26 = dma.hbm_to_vmem [thread:$0]  %s925_s0, 128, %s24_s17, [#allocation3]  }
  0x46   :  { %s652_s28 = scalar_lea.hbm %s927_s2, 16 }
  0x47   :  { %p653_p4 = scmp.ne.s32.totalorder %s927_s2, %s652_s28  ;;  %p656_p5 = scmp.lt.u32.totalorder %s652_s28, %s927_s2 }
  0x49   :  { %p658_p6 = pnand %p656_p5, %p653_p4 }
  0x4b   :  { %661 = shalt.err (!%p658_p6)
}
  0x4c   :  { %s662_s10 = scalar_lea.vmem %s46_s20, 16  ;;  %s666_s13 = scalar_lea.vmem %s46_s20, 32 }
  0x4d   :  { %p663_p7 = scmp.ne.s32.totalorder %s46_s20, %s662_s10  ;;  %p667_p8 = scmp.lt.s32.totalorder %s46_s20, %s46_s20 }
  0x4e   :  { %p668_p9 = scmp.lt.s32.totalorder %s666_s13, %s662_s10 }
  0x50   :  { %p669_p10 = por %p668_p9, %p667_p8 }
  0x52   :  { %p670_p11 = pnand %p669_p10, %p663_p7 }
  0x54   :  { %673 = shalt.err (!%p670_p11)
}
  0x55   :  { %48 = dma.hbm_to_vmem [thread:$0]  %s927_s2, 16, %s46_s20, [#allocation6]  }
  0x56   :  { %s757_s3 = smov [#allocation10]   ;;  %s758_s16 = smov [#allocation13]  }
  0x57   :  { %s67_s15 = sshll.u32 %s757_s3, 4  ;;  %s89_s17 = sshll.u32 %s758_s16, 4  ;;  %s68_s15 = int_to_ptr.vmem [resolvable:$true] %s67_s15  ;;  %s90_s17 = int_to_ptr.vmem [resolvable:$true] %s89_s17 }
  0x58   :  { %s674_s22 = scalar_lea.hbm %s929_s4, 16 }
  0x59   :  { %p675_p12 = scmp.ne.s32.totalorder %s929_s4, %s674_s22  ;;  %p678_p13 = scmp.lt.u32.totalorder %s674_s22, %s929_s4 }
  0x5b   :  { %p680_p0 = pnand %p678_p13, %p675_p12 }
  0x5d   :  { %683 = shalt.err (!%p680_p0)
}
  0x5e   :  { %s684_s2 = scalar_lea.vmem %s68_s15, 16  ;;  %s688_s20 = scalar_lea.vmem %s68_s15, 32 }
  0x5f   :  { %p685_p1 = scmp.ne.s32.totalorder %s68_s15, %s684_s2  ;;  %p689_p2 = scmp.lt.s32.totalorder %s68_s15, %s68_s15 }
  0x60   :  { %p690_p3 = scmp.lt.s32.totalorder %s688_s20, %s684_s2 }
  0x62   :  { %p691_p4 = por %p690_p3, %p689_p2 }
  0x64   :  { %p692_p5 = pnand %p691_p4, %p685_p1 }
  0x66   :  { %695 = shalt.err (!%p692_p5)
}
  0x67   :  { %70 = dma.hbm_to_vmem [thread:$0]  %s929_s4, 16, %s68_s15, [#allocation9]  }
  0x68   :  { %s696_s18 = scalar_lea.hbm %s931_s6, 16 }
  0x69   :  { %p697_p6 = scmp.ne.s32.totalorder %s931_s6, %s696_s18  ;;  %p700_p7 = scmp.lt.u32.totalorder %s696_s18, %s931_s6 }
  0x6b   :  { %p702_p8 = pnand %p700_p7, %p697_p6 }
  0x6d   :  { %705 = shalt.err (!%p702_p8)
}
  0x6e   :  { %s706_s8 = scalar_lea.vmem %s90_s17, 16  ;;  %s710_s9 = scalar_lea.vmem %s90_s17, 32 }
  0x6f   :  { %p707_p9 = scmp.ne.s32.totalorder %s90_s17, %s706_s8  ;;  %p711_p10 = scmp.lt.s32.totalorder %s90_s17, %s90_s17 }
  0x70   :  { %p712_p11 = scmp.lt.s32.totalorder %s710_s9, %s706_s8 }
  0x72   :  { %p713_p12 = por %p712_p11, %p711_p10 }
  0x74   :  { %p714_p13 = pnand %p713_p12, %p707_p9 }
  0x76   :  { %717 = shalt.err (!%p714_p13)
}
  0x77   :  { %92 = dma.hbm_to_vmem [thread:$0]  %s931_s6, 16, %s90_s17, [#allocation12]  }
  0x78   :  { %740 = dma.done.wait [#allocation3], 128  }
  0x79   :  { %741 = vsyncadd [#allocation3], 4294967168 }
  0x7a   :  { %742 = dma.done.wait [#allocation6], 528  }
  0x7b   :  { %743 = vsyncadd [#allocation6], 4294966768 }
  0x7c   :  { %744 = dma.done.wait [#allocation9], 1552  }
  0x7d   :  { %745 = vsyncadd [#allocation9], 4294965744 }
  0x7e   :  { %746 = dma.done.wait [#allocation12], 1552  }
  0x7f   :  { %747 = vsyncadd [#allocation12], 4294965744  ;;  %v759_v0 = vmov 0.0|0.0   ;;  %vm760_vm0 = vmmov 0   ;;  %v761_v1 = vmov 0.0   ;;  %v115_v2 = vld [vmem:[#allocation5] sm:$0xff] }
  0x80   :  { %509 = vmatprep.subr.bf16.mxu0 %v759_v0  ;;  %452 = vmatprep.mubr.msk.f32.mxu0 %vm760_vm0, %v761_v1  ;;  %v116_v3 = vld [vmem:[#allocation5 + $0x8] sm:$0xff]  ;;  %v117_v4 = vld [vmem:[#allocation5 + $0x10] sm:$0xff]  ;;  %v118_v6 = vld [vmem:[#allocation5 + $0x18] sm:$0xff]  ;;  %vm126_vm1 = vcmask 261120   ;;  %vm220_vm2 = vcmask 785408   ;;  %s762_s6 = smov [#allocation14]  }
  0x81   :  { %515 = vmatprep.subr.bf16.mxu1 %v759_v0  ;;  %479 = vmatprep.mubr.msk.f32.mxu1 %vm760_vm0, %v761_v1  ;;  %v510_v5 = vpack.c.bf16 %v116_v3, %v115_v2  ;;  %v201_v7 = vld [vmem:[#allocation8] sm:$0xff]  ;;  %v202_v8 = vld [vmem:[#allocation8 + $0x8] sm:$0xff]  ;;  %v203_v9 = vld [vmem:[#allocation8 + $0x10] sm:$0xff]  ;;  %v513_v11 = vpack.c.bf16 %v118_v6, %v117_v4  ;;  %s395_s13 = sshll.u32 %s762_s6, 4  ;;  %vm387_vm3 = vcmask 23552   ;;  %s396_s13 = int_to_ptr.vmem [resolvable:$true] %s395_s13 }
  0x82   :  { %v204_v10 = vld [vmem:[#allocation8 + $0x18] sm:$0xff]  ;;  %v516_v12 = vpack.c.bf16 %v202_v8, %v201_v7  ;;  %v205_v14 = vld [vmem:[#allocation8 + $0x20] sm:$0xff]  ;;  %v206_v15 = vld [vmem:[#allocation8 + $0x28] sm:$0xff]  ;;  %s718_s0 = scalar_lea.vmem %s396_s13, 128  ;;  %p723_p1 = scmp.lt.s32.totalorder %s396_s13, %s396_s13 }
  0x83   :  { %511 = vmatpush3.bf16.msra.mxu0 %v510_v5  ;;  %v519_v13 = vpack.c.bf16 %v204_v10, %v203_v9  ;;  %v114_v16 = vld [vmem:[#allocation2] sm:$0xff]  ;;  %v522_v17 = vpack.c.bf16 %v206_v15, %v205_v14  ;;  %v209_v21 = vld [vmem:[#allocation8 + $0x40] sm:$0xff]  ;;  %v210_v22 = vld [vmem:[#allocation8 + $0x48] sm:$0xff]  ;;  %p719_p0 = scmp.ne.s32.totalorder %s396_s13, %s718_s0  ;;  %p724_p2 = scmp.lt.s32.totalorder %s718_s0, %s718_s0 }
  0x84   :  { %512 = vmatprep.subr.bf16.mxu0 %v759_v0  ;;  %517 = vmatpush3.bf16.msra.mxu1 %v516_v12  ;;  %v207_v18 = vld [vmem:[#allocation8 + $0x30] sm:$0xff]  ;;  %v208_v19 = vld [vmem:[#allocation8 + $0x38] sm:$0xff]  ;;  %v528_v23 = vpack.c.bf16 %v210_v22, %v209_v21  ;;  %v295_v27 = vld [vmem:[#allocation11] sm:$0xff] }
  0x85   :  { %518 = vmatprep.subr.bf16.mxu1 %v759_v0  ;;  %v525_v20 = vpack.c.bf16 %v208_v19, %v207_v18  ;;  %v211_v24 = vld [vmem:[#allocation8 + $0x50] sm:$0xff]  ;;  %v212_v25 = vld [vmem:[#allocation8 + $0x58] sm:$0xff]  ;;  %v299_v33 = vld [vmem:[#allocation11 + $0x20] sm:$0xff]  ;;  %p725_p3 = por %p724_p2, %p723_p1 }
  0x86   :  { %v531_v26 = vpack.c.bf16 %v212_v25, %v211_v24  ;;  %v296_v28 = vld [vmem:[#allocation11 + $0x8] sm:$0xff]  ;;  %v297_v29 = vld [vmem:[#allocation11 + $0x10] sm:$0xff]  ;;  %v298_v31 = vld [vmem:[#allocation11 + $0x18] sm:$0xff] }
  0x87   :  { %514 = vmatpush3.bf16.msra.mxu0 %v513_v11  ;;  %v534_v30 = vpack.c.bf16 %v296_v28, %v295_v27  ;;  %v537_v32 = vpack.c.bf16 %v298_v31, %v297_v29  ;;  %v300_v34 = vld [vmem:[#allocation11 + $0x28] sm:$0xff]  ;;  %v301_v36 = vld [vmem:[#allocation11 + $0x30] sm:$0xff]  ;;  %v302_v37 = vld [vmem:[#allocation11 + $0x38] sm:$0xff]  ;;  %p726_p4 = pnand %p725_p3, %p719_p0 }
  0x88   :  { %533 = vmatprep.subr.bf16.mxu0 %v759_v0  ;;  %520 = vmatpush3.bf16.msra.mxu1 %v519_v13  ;;  %v540_v35 = vpack.c.bf16 %v300_v34, %v299_v33  ;;  %v543_v38 = vpack.c.bf16 %v302_v37, %v301_v36  ;;  %v303_v39 = vld [vmem:[#allocation11 + $0x40] sm:$0xff]  ;;  %v304_v40 = vld [vmem:[#allocation11 + $0x48] sm:$0xff]  ;;  %v407_v42 = vld [vmem:[#allocation7] ss:$0 sm:$0xff] }
  0x89   :  { %521 = vmatprep.subr.bf16.mxu1 %v759_v0  ;;  %v546_v41 = vpack.c.bf16 %v304_v40, %v303_v39  ;;  %v305_v47 = vld [vmem:[#allocation11 + $0x50] sm:$0xff]  ;;  %v306_v48 = vld [vmem:[#allocation11 + $0x58] sm:$0xff]  ;;  %v411_v55 = vld [vmem:[#allocation13] ss:$0 sm:$0xff] }
  0x8a   :  { %453 = vmatmul.mubr.msk.f32.vlgmr.msra.gmra.mrb[0].mxu0 %vm126_vm1, %v114_v16  ;;  %v549_v49 = vpack.c.bf16 %v306_v48, %v305_v47  ;;  %v409_v50 = vld [vmem:[#allocation10] ss:$0 sm:$0xff] }
  0x8b   :  { %506 = vmatprep.mubr.msk.f32.mxu0 %vm760_vm0, %v761_v1  ;;  %535 = vmatpush3.bf16.msra.mxu0 %v534_v30 }
  0x8c   :  { %523 = vmatpush3.bf16.msra.mxu1 %v522_v17  ;;  %536 = vmatprep.subr.bf16.mxu0 %v759_v0 }
  0x8d   :  { %524 = vmatprep.subr.bf16.mxu1 %v759_v0 }
  0x8f   :  { %538 = vmatpush3.bf16.msra.mxu0 %v537_v32 }
  0x90   :  { %526 = vmatpush3.bf16.msra.mxu1 %v525_v20  ;;  %539 = vmatprep.subr.bf16.mxu0 %v759_v0 }
  0x91   :  { %527 = vmatprep.subr.bf16.mxu1 %v759_v0 }
  0x93   :  { %541 = vmatpush3.bf16.msra.mxu0 %v540_v35 }
  0x94   :  { %529 = vmatpush3.bf16.msra.mxu1 %v528_v23  ;;  %542 = vmatprep.subr.bf16.mxu0 %v759_v0 }
  0x95   :  { %530 = vmatprep.subr.bf16.mxu1 %v759_v0 }
  0x97   :  { %544 = vmatpush3.bf16.msra.mxu0 %v543_v38 }
  0x98   :  { %532 = vmatpush3.bf16.msra.mxu1 %v531_v26  ;;  %545 = vmatprep.subr.bf16.mxu0 %v759_v0 }
  0x9b   :  { %547 = vmatpush3.bf16.msra.mxu0 %v546_v41 }
  0x9c   :  { %548 = vmatprep.subr.bf16.mxu0 %v759_v0 }
  0x9f   :  { %550 = vmatpush3.bf16.msra.mxu0 %v549_v49 }
 0x15d   :  { %v196_v43 = vpop.f32.mrb[0].mxu0 }
 0x15e   :  { %v197_v44 = vadd.f32 %v407_v42, %v196_v43  ;;  %v454_v45 = vpop.f32.mrb[1].mxu0 }
 0x160   :  { %v200_v46 = vmax.f32 %v197_v44, 0.0 }
 0x162   :  { %480 = vmatmul.mubr.msk.f32.vlgmr.msra.gmra.mrb[0].mxu1 %vm220_vm2, %v200_v46 }
 0x235   :  { %v290_v51 = vpop.f32.mrb[0].mxu1 }
 0x236   :  { %v291_v52 = vadd.f32 %v409_v50, %v290_v51  ;;  %v481_v53 = vpop.f32.mrb[1].mxu1 }
 0x238   :  { %v294_v54 = vmax.f32 %v291_v52, 0.0 }
 0x23a   :  { %507 = vmatmul.mubr.msk.f32.vlgmr.msra.gmra.mrb[2].mxu0 %vm220_vm2, %v294_v54 }
 0x30d   :  { %v383_v56 = vpop.f32.mrb[2].mxu0 }
 0x30e   :  { %v384_v57 = vadd.f32 %v411_v55, %v383_v56  ;;  %v508_v58 = vpop.f32.mrb[3].mxu0 }
 0x310   :  { %388 = vst.msk [vmem:[#allocation14] sm:$0xff] %vm387_vm3, %v384_v57 }
 0x311   :  { %729 = shalt.err (!%p726_p4)
}
 0x312   :  { %s730_s15 = scalar_lea.hbm %s932_s7, 128 }
 0x313   :  { %p731_p5 = scmp.ne.s32.totalorder %s932_s7, %s730_s15  ;;  %p734_p6 = scmp.lt.u32.totalorder %s730_s15, %s932_s7 }
 0x315   :  { %p736_p7 = pnand %p734_p6, %p731_p5 }
 0x317   :  { %739 = shalt.err (!%p736_p7)
}
 0x318   :  { %398 = dma.vmem_to_hbm [thread:$0]  %s396_s13, 128, %s932_s7, [#allocation4]  }
 0x319   :  { %748 = dma.done.wait [#allocation4], 128  }
 0x31a   :  { %749 = vsyncadd [#allocation4], 4294967168 }
 0x31b   :  { %402 = vsyncpa [#allocation3], 1 }
 0x31c   :  { %403 = vsyncpa [#allocation6], 1 }
 0x31d   :  { %404 = vsyncpa [#allocation9], 1 }
 0x31e   :  { %405 = vsyncpa [#allocation12], 1 }
 0x31f   :  { %406 = vsyncpa [#allocation4], 1 }

</bundles_post_ra>
